<compile_context>
chip_gen: v6e
topology: v6e:2x2x1
jax: 0.10.0
libtpu: 0.0.40
codegen_flags: <defaults>
</compile_context>

<pallas_src>
import functools

import jax
import jax.numpy as jnp
from jax.experimental import pallas as pl
from jax.experimental.pallas import tpu as pltpu

MARGIN = 0.1


def _round_up(x, m):
    return ((x + m - 1) // m) * m


def _cdiv(a, b):
    return (a + b - 1) // b


def _neg_sqdist_kernel(q_ref, neg_ref, out_ref, *, td, d_per, d_tiles, dim):
    """Accumulate per-row sum((neg - q)^2) over this program's slice of D.

    q_ref   : (d_tiles, td)   query, resident (row i == q[i*td:(i+1)*td], zero padded)
    neg_ref : (tn, td)        one negatives tile (incoming dtype, upcast in-register)
    out_ref : (1, 1, tn, 1)   f32 accumulator, resident across the d grid axis
    """
    s = pl.program_id(0)          # D-range split ("parallel", feeds both v7x TCs)
    d = pl.program_id(2)          # D-tile step within this split ("arbitrary")

    @pl.when(d == 0)
    def _init():
        out_ref[...] = jnp.zeros_like(out_ref)

    d_idx = s * d_per + d                        # intended global D-tile index
    d_idx_c = jnp.minimum(d_idx, d_tiles - 1)    # index actually DMA'd (index_map clamps
    d_start = d_idx * td                         # the same way; OOB tiles are fully masked)

    q = q_ref[pl.ds(d_idx_c, 1), :].astype(jnp.float32)      # (1, td)
    negs = neg_ref[...].astype(jnp.float32)                    # (tn, td)

    def _accumulate(dn):
        out_ref[...] += jnp.sum(dn * dn, axis=-1, keepdims=True).reshape(out_ref.shape)

    # Fast path: tile fully inside the valid D range -> no masking work on the VPU.
    @pl.when(d_start + td <= dim)
    def _full():
        _accumulate(negs - q)

    # Tail (or fully out-of-range) tile: lane-mask the invalid columns.
    @pl.when(d_start + td > dim)
    def _tail():
        lane = d_start + jax.lax.broadcasted_iota(jnp.int32, negs.shape, 1)
        _accumulate(jnp.where(lane < dim, negs - q, 0.0))


def triplet_margin_loss(query, positive, negatives, *, margin=MARGIN,
                        tile_bytes=8 * 1024 * 1024, tile_d=None):
    """query/positive: anything flattening to (D,); negatives: (N, ...) -> (N, D)."""
    q = jnp.reshape(jnp.asarray(query), (-1,)).astype(jnp.float32)
    p = jnp.reshape(jnp.asarray(positive), (-1,)).astype(jnp.float32)
    negs = jnp.asarray(negatives)                      # keep incoming dtype (no promotion)
    negs = negs.reshape(negs.shape[0], -1)
    num_negs, dim = negs.shape
    assert q.shape[0] == dim and p.shape[0] == dim

    # Positive distance: tiny, computed once in plain JAX (hoisted out of the kernel).
    pos_dist = jnp.sqrt(jnp.sum((q - p) ** 2))

    itemsize = jnp.dtype(negs.dtype).itemsize

    # --- tile selection from a VMEM byte budget --------------------------------
    max_tn = 256
    tn = num_negs if num_negs <= max_tn else max_tn          # ==N (legal: full dim) or x8
    if tile_d is None:
        td_budget = max(128, (tile_bytes // max(tn * itemsize, 1)) // 128 * 128)
        td = min(_round_up(dim, 128), td_budget)
    else:
        td = min(max(128, _round_up(int(tile_d), 128)), _round_up(dim, 128))
    n_tiles = _cdiv(num_negs, tn)
    d_tiles = _cdiv(dim, td)

    # v7x megacore: if the parallel axes would hold a single program, split D in two.
    if n_tiles == 1 and d_tiles == 1 and _round_up(dim, 128) >= 256:
        td = _round_up(_cdiv(dim, 2), 128)
        d_tiles = _cdiv(dim, td)
    if n_tiles == 1 and d_tiles >= 2:
        n_splits = 2
        d_per = _cdiv(d_tiles, 2)        # last split may over-run -> clamped + masked
    else:
        n_splits = 1
        d_per = d_tiles

    # Query, resident once in VMEM as (d_tiles, td); tiny zero-pad (< td elements).
    q_pad = d_tiles * td
    q_res = jnp.pad(q, (0, q_pad - dim)).reshape(d_tiles, td)

    kernel = functools.partial(_neg_sqdist_kernel, td=td, d_per=d_per,
                               d_tiles=d_tiles, dim=dim)

    # Double-buffered negatives + resident query + headroom; capped at 48 MiB so the
    # same config stays inside v7x's 64 MiB VMEM (v5e/v6e have 128 MiB physical).
    need = 2 * tn * td * itemsize + 2 * q_pad * 4
    vmem_limit = int(max(32 * 1024 * 1024,
                         min(need + (8 << 20), 48 * 1024 * 1024)))

    partial_sq = pl.pallas_call(
        kernel,
        out_shape=jax.ShapeDtypeStruct((n_splits, n_tiles, tn, 1), jnp.float32),
        grid=(n_splits, n_tiles, d_per),
        in_specs=[
            # Query: constant block index -> DMA'd once, stays resident.
            pl.BlockSpec((d_tiles, td), lambda s, n, d: (0, 0)),
            # Negatives: (tn, td) tile; D-block index clamped so the DMA never
            # goes past the array (over-run tiles are fully masked in-kernel).
            pl.BlockSpec((tn, td),
                         lambda s, n, d: (n, jnp.minimum(s * d_per + d, d_tiles - 1))),
        ],
        out_specs=pl.BlockSpec((1, 1, tn, 1), lambda s, n, d: (s, n, 0, 0)),
        compiler_params=pltpu.CompilerParams(
            dimension_semantics=("parallel", "parallel", "arbitrary"),
            vmem_limit_bytes=vmem_limit,
        ),
    )(q_res, negs)

    # Host finalize: combine the D-splits, drop ragged-N garbage rows, sqrt, reduce.
    sq = jnp.sum(partial_sq, axis=0).reshape(-1)[:num_negs]
    neg_dists = jnp.sqrt(sq)
    return num_negs * (pos_dist + margin) - jnp.sum(neg_dists)


def _reference(query, positive, negatives, margin=MARGIN):
    q = jnp.reshape(query, (-1,)).astype(jnp.float32)
    p = jnp.reshape(positive, (-1,)).astype(jnp.float32)
    negs = jnp.asarray(negatives).astype(jnp.float32)
    pos_d = jnp.sqrt(jnp.sum((q - p) ** 2))
    neg_d = jnp.sqrt(jnp.sum((negs - q[None, :]) ** 2, axis=1))
    return jnp.sum(pos_d + margin - neg_d)


if __name__ == "__main__":
    key = jax.random.PRNGKey(0)
    keys = jax.random.split(key, 12)
    RTOL, ATOL = 1e-3, 1e-3

    # Case 1: lane-aligned, single tile, no masking / splitting.
    d0, n0 = 128, 8
    q0 = jax.random.normal(keys[0], (d0,), jnp.float32)
    p0 = jax.random.normal(keys[1], (d0,), jnp.float32)
    neg0 = jax.random.normal(keys[2], (n0, d0), jnp.float32)
    loss0 = jax.block_until_ready(triplet_margin_loss(q0, p0, neg0))
    assert jnp.allclose(loss0, _reference(q0, p0, neg0), rtol=RTOL, atol=ATOL), loss0

    # Case 2: ragged D -> lane-masked tail tile + 2-way parallel D split (no host pad).
    d1, n1 = 200, 10
    q1 = jax.random.normal(keys[3], (d1,), jnp.float32)
    p1 = jax.random.normal(keys[4], (d1,), jnp.float32)
    neg1 = jax.random.normal(keys[5], (n1, d1), jnp.float32)
    loss1 = jax.block_until_ready(triplet_margin_loss(q1, p1, neg1))
    assert jnp.allclose(loss1, _reference(q1, p1, neg1), rtol=RTOL, atol=ATOL), loss1

    # Case 3: odd D-tile count -> exercises the clamped index_map + fully-masked tile.
    d2, n2 = 300, 6
    q2 = jax.random.normal(keys[6], (d2,), jnp.float32)
    p2 = jax.random.normal(keys[7], (d2,), jnp.float32)
    neg2 = jax.random.normal(keys[8], (n2, d2), jnp.float32)
    loss2 = jax.block_until_ready(triplet_margin_loss(q2, p2, neg2, tile_d=128))
    assert jnp.allclose(loss2, _reference(q2, p2, neg2), rtol=RTOL, atol=ATOL), loss2

    # Case 4: bf16 negatives stay bf16 in HBM (no promotion); q/p stay f32.
    d3, n3 = 384, 12
    q3 = jax.random.normal(keys[9], (d3,), jnp.float32)
    p3 = jax.random.normal(keys[10], (d3,), jnp.float32)
    neg3 = jax.random.normal(keys[11], (n3, d3), jnp.float32).astype(jnp.bfloat16)
    loss3 = jax.block_until_ready(triplet_margin_loss(q3, p3, neg3))
    assert jnp.allclose(loss3, _reference(q3, p3, neg3), rtol=RTOL, atol=ATOL), loss3

    print("KERNEL_OK")
</pallas_src>

<mosaic_0001>
module attributes {stable_mosaic.version = 11 : i64} {
  func.func @_neg_sqdist_kernel(%arg0: i32, %arg1: i32, %arg2: i32, %arg3: memref<1x128xf32, #tpu.memory_space<vmem>>, %arg4: memref<8x128xf32, #tpu.memory_space<vmem>>, %arg5: memref<1x1x8x1xf32, #tpu.memory_space<vmem>>) attributes {dimension_semantics = [#tpu.dimension_semantics<parallel>, #tpu.dimension_semantics<parallel>, #tpu.dimension_semantics<arbitrary>], iteration_bounds = array<i64: 1, 1, 1>, scalar_prefetch = 0 : i64, scratch_operands = 0 : i64, tpu.core_type = #tpu.core_type<tc>, window_params = [{pipeline_mode = #tpu.pipeline_mode<synchronous>, transform_indices = @transform_0, window_bounds = array<i64: 1, 128>}, {transform_indices = @transform_1, window_bounds = array<i64: 8, 128>}, {transform_indices = @transform_2, window_bounds = array<i64: 1, 1, 8, 1>}]} {
    %c0_i32 = arith.constant 0 : i32
    %0 = arith.cmpi eq, %arg2, %c0_i32 : i32
    %1 = arith.extui %0 : i1 to i32
    %c0_i32_0 = arith.constant 0 : i32
    %2 = arith.cmpi ne, %1, %c0_i32_0 : i32
    scf.if %2 {
      %cst = arith.constant 0.000000e+00 : f32
      %18 = vector.broadcast %cst : f32 to vector<1x1x8x1xf32>
      %c0_10 = arith.constant 0 : index
      %c0_11 = arith.constant 0 : index
      %c0_12 = arith.constant 0 : index
      %c0_13 = arith.constant 0 : index
      %19 = vector.load %arg5[%c0_10, %c0_11, %c0_12, %c0_13] : memref<1x1x8x1xf32, #tpu.memory_space<vmem>>, vector<1x1x8x1xf32>
      tpu.vector_store %arg5[%c0_10, %c0_11, %c0_12, %c0_13], %18 {strides = array<i32>} : memref<1x1x8x1xf32, #tpu.memory_space<vmem>>, vector<1x1x8x1xf32>,
    } else {
    }
    %c1_i32 = arith.constant 1 : i32
    %3 = arith.muli %arg0, %c1_i32 : i32
    %4 = arith.addi %3, %arg2 : i32
    %c0_i32_1 = arith.constant 0 : i32
    %5 = arith.minsi %4, %c0_i32_1 : i32
    %c128_i32 = arith.constant 128 : i32
    %6 = arith.muli %4, %c128_i32 : i32
    %7 = arith.index_cast %5 : i32 to index
    %c0 = arith.constant 0 : index
    %8 = vector.load %arg3[%7, %c0] : memref<1x128xf32, #tpu.memory_space<vmem>>, vector<1x128xf32>
    %c0_2 = arith.constant 0 : index
    %c0_3 = arith.constant 0 : index
    %9 = vector.load %arg4[%c0_2, %c0_3] : memref<8x128xf32, #tpu.memory_space<vmem>>, vector<8x128xf32>
    %c128_i32_4 = arith.constant 128 : i32
    %10 = arith.addi %6, %c128_i32_4 : i32
    %c128_i32_5 = arith.constant 128 : i32
    %11 = arith.cmpi sle, %10, %c128_i32_5 : i32
    %12 = arith.extui %11 : i1 to i32
    %c0_i32_6 = arith.constant 0 : i32
    %13 = arith.cmpi ne, %12, %c0_i32_6 : i32
    scf.if %13 {
      %18 = vector.broadcast %8 : vector<1x128xf32> to vector<8x128xf32>
      %19 = arith.subf %9, %18 : vector<8x128xf32>
      %c0_10 = arith.constant 0 : index
      %c0_11 = arith.constant 0 : index
      %c0_12 = arith.constant 0 : index
      %c0_13 = arith.constant 0 : index
      %20 = vector.load %arg5[%c0_10, %c0_11, %c0_12, %c0_13] : memref<1x1x8x1xf32, #tpu.memory_space<vmem>>, vector<1x1x8x1xf32>
      %21 = arith.mulf %19, %19 : vector<8x128xf32>
      %cst = arith.constant dense<0.000000e+00> : vector<8xf32>
      %22 = vector.multi_reduction <add>, %21, %cst [1] : vector<8x128xf32> to vector<8xf32>
      %23 = vector.shape_cast %22 : vector<8xf32> to vector<8x1xf32>
      %24 = vector.shape_cast %23 : vector<8x1xf32> to vector<1x1x8x1xf32>
      %25 = arith.addf %20, %24 : vector<1x1x8x1xf32>
      %c0_14 = arith.constant 0 : index
      %c0_15 = arith.constant 0 : index
      %c0_16 = arith.constant 0 : index
      %c0_17 = arith.constant 0 : index
      %26 = vector.load %arg5[%c0_14, %c0_15, %c0_16, %c0_17] : memref<1x1x8x1xf32, #tpu.memory_space<vmem>>, vector<1x1x8x1xf32>
      tpu.vector_store %arg5[%c0_14, %c0_15, %c0_16, %c0_17], %25 {strides = array<i32>} : memref<1x1x8x1xf32, #tpu.memory_space<vmem>>, vector<1x1x8x1xf32>,
    } else {
    }
    %c128_i32_7 = arith.constant 128 : i32
    %14 = arith.addi %6, %c128_i32_7 : i32
    %c128_i32_8 = arith.constant 128 : i32
    %15 = arith.cmpi sgt, %14, %c128_i32_8 : i32
    %16 = arith.extui %15 : i1 to i32
    %c0_i32_9 = arith.constant 0 : i32
    %17 = arith.cmpi ne, %16, %c0_i32_9 : i32
    scf.if %17 {
      %18 = tpu.iota {dimensions = array<i32: 1>} : vector<8x128xi32>
      %19 = vector.broadcast %6 : i32 to vector<8x128xi32>
      %20 = arith.addi %19, %18 : vector<8x128xi32>
      %c128_i32_10 = arith.constant 128 : i32
      %21 = vector.broadcast %c128_i32_10 : i32 to vector<8x128xi32>
      %22 = arith.cmpi slt, %20, %21 : vector<8x128xi32>
      %23 = vector.broadcast %8 : vector<1x128xf32> to vector<8x128xf32>
      %24 = arith.subf %9, %23 : vector<8x128xf32>
      %cst = arith.constant 0.000000e+00 : f32
      %25 = vector.broadcast %cst : f32 to vector<8x128xf32>
      %26 = arith.select %22, %24, %25 : vector<8x128xi1>, vector<8x128xf32>
      %c0_11 = arith.constant 0 : index
      %c0_12 = arith.constant 0 : index
      %c0_13 = arith.constant 0 : index
      %c0_14 = arith.constant 0 : index
      %27 = vector.load %arg5[%c0_11, %c0_12, %c0_13, %c0_14] : memref<1x1x8x1xf32, #tpu.memory_space<vmem>>, vector<1x1x8x1xf32>
      %28 = arith.mulf %26, %26 : vector<8x128xf32>
      %cst_15 = arith.constant dense<0.000000e+00> : vector<8xf32>
      %29 = vector.multi_reduction <add>, %28, %cst_15 [1] : vector<8x128xf32> to vector<8xf32>
      %30 = vector.shape_cast %29 : vector<8xf32> to vector<8x1xf32>
      %31 = vector.shape_cast %30 : vector<8x1xf32> to vector<1x1x8x1xf32>
      %32 = arith.addf %27, %31 : vector<1x1x8x1xf32>
      %c0_16 = arith.constant 0 : index
      %c0_17 = arith.constant 0 : index
      %c0_18 = arith.constant 0 : index
      %c0_19 = arith.constant 0 : index
      %33 = vector.load %arg5[%c0_16, %c0_17, %c0_18, %c0_19] : memref<1x1x8x1xf32, #tpu.memory_space<vmem>>, vector<1x1x8x1xf32>
      tpu.vector_store %arg5[%c0_16, %c0_17, %c0_18, %c0_19], %32 {strides = array<i32>} : memref<1x1x8x1xf32, #tpu.memory_space<vmem>>, vector<1x1x8x1xf32>,
    } else {
    }
    return
  }
  func.func @transform_0(%arg0: i32, %arg1: i32, %arg2: i32) -> (i32, i32) {
    %c0_i32 = arith.constant 0 : i32
    %c0_i32_0 = arith.constant 0 : i32
    %c0_i32_1 = arith.constant 0 : i32
    return %c0_i32, %c0_i32_0 : i32, i32
  }
  func.func @transform_1(%arg0: i32, %arg1: i32, %arg2: i32) -> (i32, i32) {
    %c1_i32 = arith.constant 1 : i32
    %0 = arith.muli %arg0, %c1_i32 : i32
    %1 = arith.addi %0, %arg2 : i32
    %c0_i32 = arith.constant 0 : i32
    %2 = arith.minsi %1, %c0_i32 : i32
    %c0_i32_0 = arith.constant 0 : i32
    return %arg1, %2 : i32, i32
  }
  func.func @transform_2(%arg0: i32, %arg1: i32, %arg2: i32) -> (i32, i32, i32, i32) {
    %c0_i32 = arith.constant 0 : i32
    %c0_i32_0 = arith.constant 0 : i32
    %c0_i32_1 = arith.constant 0 : i32
    return %arg0, %arg1, %c0_i32, %c0_i32_0 : i32, i32, i32, i32
  }
}

</mosaic_0001>

<bundles_post_ra>
// kernel: tpu_custom_call.1
= control target key start
LH: loop header
LB: loop body
LE: loop exit
PB: predicated region body
PF: predicated region fallthrough
CT: control target
= control target key end

     0   :  { %7 = vsyncpa [#allocation3], 0  ;;  %s189_s0 = inlined_call_operand.hbm [shape: f32[1,128], index: 0, kind: input, shape index: {}]   ;;  %s190_s1 = inlined_call_operand.hbm [shape: f32[8,128], index: 1, kind: input, shape index: {}]   ;;  %s191_s2 = inlined_call_operand.vmem [shape: f32[1,1,8,1], index: 2, kind: output, shape index: {}]  }
   0x1   :  { %8 = vsyncpa [#allocation5], 0  ;;  %s156_s9 = smov [#allocation2]   ;;  %s157_s11 = smov [#allocation4]  }
   0x2   :  { %s15_s10 = sshll.u32 %s156_s9, 4  ;;  %s30_s12 = sshll.u32 %s157_s11, 4  ;;  %s16_s10 = int_to_ptr.vmem [resolvable:$true] %s15_s10  ;;  %s31_s12 = int_to_ptr.vmem [resolvable:$true] %s30_s12 }
   0x3   :  { %s120_s13 = scalar_lea.vmem %s16_s10, 16  ;;  %s124_s14 = scalar_lea.vmem %s16_s10, 32 }
   0x4   :  { %p121_p0 = scmp.ne.s32.totalorder %s16_s10, %s120_s13  ;;  %p125_p1 = scmp.lt.s32.totalorder %s16_s10, %s16_s10 }
   0x5   :  { %p126_p2 = scmp.lt.s32.totalorder %s124_s14, %s120_s13 }
   0x7   :  { %p127_p3 = por %p126_p2, %p125_p1 }
   0x9   :  { %p128_p4 = pnand %p127_p3, %p121_p0 }
   0xb   :  { %131 = shalt.err (!%p128_p4)
}
   0xc   :  { %18 = dma.hbm_to_vmem [thread:$0]  %s189_s0, 16, %s16_s10, [#allocation3]  }
   0xd   :  { %s140_s17 = scalar_lea.vmem %s31_s12, 128  ;;  %p145_p6 = scmp.lt.s32.totalorder %s31_s12, %s31_s12 }
   0xe   :  { %p141_p5 = scmp.ne.s32.totalorder %s31_s12, %s140_s17  ;;  %p146_p7 = scmp.lt.s32.totalorder %s140_s17, %s140_s17 }
  0x10   :  { %p147_p8 = por %p146_p7, %p145_p6 }
  0x12   :  { %p148_p9 = pnand %p147_p8, %p141_p5 }
  0x14   :  { %151 = shalt.err (!%p148_p9)
}
  0x15   :  { %33 = dma.hbm_to_vmem [thread:$0]  %s190_s1, 128, %s31_s12, [#allocation5]  }
  0x16   :  { %152 = dma.done.wait [#allocation3], 16  }
  0x17   :  { %153 = vsyncadd [#allocation3], 4294967280 }
  0x18   :  { %154 = dma.done.wait [#allocation5], 128  }
  0x19   :  { %155 = vsyncadd [#allocation5], 4294967168  ;;  %vm47_vm0 = vcmask 7168   ;;  %v158_v0 = vmov 0.0   ;;  %v108_v1 = vld [vmem:[#allocation2] ss:$0 sm:$0xff] }
  0x1a   :  { %48 = vst.msk [vmem:[%s191_s2] sm:$0xff] %vm47_vm0, %v158_v0  ;;  %v55_v2 = vld [vmem:[#allocation4] sm:$0xff] }
  0x1b   :  { %v67_v3 = vsub.f32 %v55_v2, %v108_v1 }
  0x1d   :  { %v69_v4 = vmul.f32 %v67_v3, %v67_v3 }
  0x1f   :  { %70 = vadd.xlane.f32.xlu0 %v69_v4 }
  0x21   :  { %v68_v5 = vld [vmem:[%s191_s2] sm:$0xff] }
  0xa8   :  { %v71_v6 = vpop.xlane.xlu0 %70 }
  0xa9   :  { %v72_v7 = vadd.f32 %v71_v6, %v68_v5 }
  0xab   :  { %74 = vst.msk [vmem:[%s191_s2] sm:$0xff] %vm47_vm0, %v72_v7 }
  0xac   :  { %103 = vsyncpa [#allocation3], 1 }
  0xad   :  { %104 = vsyncpa [#allocation5], 1 }

</bundles_post_ra>
